<compile_context>
chip_gen: v6e
topology: v6e:2x2x1
jax: 0.10.0
libtpu: 0.0.40
codegen_flags: <defaults>
</compile_context>

<pallas_src>
import functools
import math

import jax
import jax.numpy as jnp
from jax.experimental import pallas as pl
from jax.experimental.pallas import tpu as pltpu


# ----------------------------- kernels ------------------------------------- #

def _pe_add_kernel(x_ref, pe_ref, o_ref):
    """Eval / p==0 path: out = x + pe (pure HBM-roofline add)."""
    o_ref[...] = (x_ref[...] + pe_ref[...]).astype(o_ref.dtype)


def _pe_add_dropout_kernel(x_ref, pe_ref, bits_ref, o_ref, *, threshold, scale):
    """Training path: out = dropout(x + pe), mask = (bits >= threshold)."""
    y = x_ref[...] + pe_ref[...]                              # VPU add
    keep = bits_ref[...] >= jnp.uint32(threshold)             # integer compare
    o_ref[...] = jnp.where(
        keep, y * jnp.float32(scale), jnp.float32(0.0)
    ).astype(o_ref.dtype)


# ----------------------------- helpers ------------------------------------- #

def make_pe_buffer(d_model: int, max_len: int = 5000) -> jax.Array:
    """Deterministic `pe` buffer, replicating the PyTorch __init__ exactly."""
    position = jnp.arange(0, d_model, dtype=jnp.float32)[:, None]        # (D, 1)
    div_term = jnp.exp(
        jnp.arange(0, d_model, 2, dtype=jnp.float32) * (-math.log(10000.0) / d_model)
    )                                                                    # (D//2,)
    sin_part = jnp.sin(position * div_term)                              # (D, D//2)
    cos_part = jnp.cos(position * div_term)                              # (D, D//2)
    # PyTorch `pe[:, 0::2] = sin_part` only shape-checks when max_len == d_model
    # (quirk of the reference module); replicate it.
    assert max_len == d_model, "reference init only works when max_len == d_model"
    pe = jnp.zeros((max_len, d_model), jnp.float32)
    pe = pe.at[:, 0::2].set(sin_part)
    pe = pe.at[:, 1::2].set(cos_part)
    return pe[None]                                                      # (1, max_len, D)


def _choose_s_tile(S: int, D: int, bytes_per_elem: int = 4,
                   target_bytes: int = 2 * 1024 * 1024) -> int:
    """Largest sequence tile that is a multiple of 8, divides S if possible,
    and keeps one (1, TS, D) buffer under ~2 MiB (safe on v5e/v6e/v7x)."""
    if S * D * bytes_per_elem <= target_bytes:
        return S
    max_rows = max(8, target_bytes // (D * bytes_per_elem))
    ts = max(8, (max_rows // 8) * 8)
    # prefer an exact divisor of S to avoid ragged tail blocks
    cand = ts
    while cand > 8 and S % cand != 0:
        cand -= 8
    if S % cand == 0:
        ts = cand
    return min(ts, S)


# ----------------------------- wrapper ------------------------------------- #

def positional_encoding_forward(x, pe, *, key=None, p=0.1, training=True):
    """x: (B, S, D) f32; pe: (1, max_len, D) f32. Returns (B, S, D) f32."""
    B, S, D = x.shape
    pe_slice = pe[:, :S, :]                       # glue: pe[:, :x.size(1)]

    ts = _choose_s_tile(S, D)
    grid = (pl.cdiv(S, ts), B)                    # batch innermost -> pe tile reused

    x_spec = pl.BlockSpec((1, ts, D), lambda s, b: (b, s, 0))
    pe_spec = pl.BlockSpec((1, ts, D), lambda s, b: (0, s, 0))   # ignores batch
    out_spec = pl.BlockSpec((1, ts, D), lambda s, b: (b, s, 0))

    cparams = pltpu.CompilerParams(
        dimension_semantics=("parallel", "parallel"),   # both axes independent
    )

    if training and p > 0.0:
        if key is None:
            key = jax.random.PRNGKey(0)
        bits = jax.random.bits(key, (B, S, D), dtype=jnp.uint32)
        threshold = min(int(round(p * (1 << 32))), (1 << 32) - 1)
        scale = 1.0 / (1.0 - p)
        kernel = functools.partial(
            _pe_add_dropout_kernel, threshold=threshold, scale=scale
        )
        return pl.pallas_call(
            kernel,
            out_shape=jax.ShapeDtypeStruct((B, S, D), x.dtype),
            grid=grid,
            in_specs=[x_spec, pe_spec,
                      pl.BlockSpec((1, ts, D), lambda s, b: (b, s, 0))],
            out_specs=out_spec,
            compiler_params=cparams,
        )(x, pe_slice, bits)

    # eval mode / p == 0: pure add, no PRNG work emitted at all
    return pl.pallas_call(
        _pe_add_kernel,
        out_shape=jax.ShapeDtypeStruct((B, S, D), x.dtype),
        grid=grid,
        in_specs=[x_spec, pe_spec],
        out_specs=out_spec,
        compiler_params=cparams,
    )(x, pe_slice)


# ------------------------------- demo --------------------------------------- #

if __name__ == "__main__":
    # lane-dense demo shapes: D multiple of 128, S multiple of 8
    B, S, D = 2, 16, 128
    max_len = D  # see quirk note above

    key = jax.random.PRNGKey(0)
    kx, kd = jax.random.split(key)
    x = jax.random.normal(kx, (B, S, D), dtype=jnp.float32)

    pe = make_pe_buffer(D, max_len)

    # training path (dropout active)
    out = positional_encoding_forward(x, pe, key=kd, p=0.1, training=True)
    jax.block_until_ready(out)

    # loose sanity: roughly p of the elements should be dropped
    zero_frac = jnp.mean((out == 0.0).astype(jnp.float32))
    assert 0.03 < float(zero_frac) < 0.20, f"unexpected dropout fraction {zero_frac}"

    # eval path must equal plain x + pe
    out_eval = positional_encoding_forward(x, pe, p=0.1, training=False)
    jax.block_until_ready(out_eval)
    assert jnp.allclose(out_eval, x + pe[:, :S, :], atol=1e-6)

    print("KERNEL_OK")
</pallas_src>

<mosaic_0001>
module attributes {stable_mosaic.version = 11 : i64} {
  func.func @_pe_add_dropout_kernel(%arg0: i32, %arg1: i32, %arg2: memref<1x16x128xf32, #tpu.memory_space<vmem>>, %arg3: memref<1x16x128xf32, #tpu.memory_space<vmem>>, %arg4: memref<1x16x128xi32, #tpu.memory_space<vmem>>, %arg5: memref<1x16x128xf32, #tpu.memory_space<vmem>>) attributes {dimension_semantics = [#tpu.dimension_semantics<parallel>, #tpu.dimension_semantics<parallel>], iteration_bounds = array<i64: 1, 2>, scalar_prefetch = 0 : i64, scratch_operands = 0 : i64, tpu.core_type = #tpu.core_type<tc>, window_params = [{transform_indices = @transform_0, window_bounds = array<i64: 1, 16, 128>}, {transform_indices = @transform_1, window_bounds = array<i64: 1, 16, 128>}, {transform_indices = @transform_2, window_bounds = array<i64: 1, 16, 128>}, {transform_indices = @transform_3, window_bounds = array<i64: 1, 16, 128>}]} {
    %c0 = arith.constant 0 : index
    %c0_0 = arith.constant 0 : index
    %c0_1 = arith.constant 0 : index
    %0 = vector.load %arg2[%c0, %c0_0, %c0_1] : memref<1x16x128xf32, #tpu.memory_space<vmem>>, vector<1x16x128xf32>
    %c0_2 = arith.constant 0 : index
    %c0_3 = arith.constant 0 : index
    %c0_4 = arith.constant 0 : index
    %1 = vector.load %arg3[%c0_2, %c0_3, %c0_4] : memref<1x16x128xf32, #tpu.memory_space<vmem>>, vector<1x16x128xf32>
    %2 = arith.addf %0, %1 : vector<1x16x128xf32>
    %c0_5 = arith.constant 0 : index
    %c0_6 = arith.constant 0 : index
    %c0_7 = arith.constant 0 : index
    %3 = vector.load %arg4[%c0_5, %c0_6, %c0_7] : memref<1x16x128xi32, #tpu.memory_space<vmem>>, vector<1x16x128xi32>
    %c429496730_i32 = arith.constant 429496730 : i32
    %4 = vector.broadcast %c429496730_i32 : i32 to vector<1x16x128xi32>
    %5 = arith.cmpi uge, %3, %4 : vector<1x16x128xi32>
    %cst = arith.constant 1.11111116 : f32
    %6 = vector.broadcast %cst : f32 to vector<1x16x128xf32>
    %7 = arith.mulf %2, %6 : vector<1x16x128xf32>
    %cst_8 = arith.constant 0.000000e+00 : f32
    %8 = vector.broadcast %cst_8 : f32 to vector<1x16x128xf32>
    %9 = arith.select %5, %7, %8 : vector<1x16x128xi1>, vector<1x16x128xf32>
    %c0_9 = arith.constant 0 : index
    %c0_10 = arith.constant 0 : index
    %c0_11 = arith.constant 0 : index
    %10 = vector.load %arg5[%c0_9, %c0_10, %c0_11] : memref<1x16x128xf32, #tpu.memory_space<vmem>>, vector<1x16x128xf32>
    tpu.vector_store %arg5[%c0_9, %c0_10, %c0_11], %9 {strides = array<i32>} : memref<1x16x128xf32, #tpu.memory_space<vmem>>, vector<1x16x128xf32>,
    return
  }
  func.func @transform_0(%arg0: i32, %arg1: i32) -> (i32, i32, i32) {
    %c0_i32 = arith.constant 0 : i32
    %c0_i32_0 = arith.constant 0 : i32
    return %arg1, %arg0, %c0_i32 : i32, i32, i32
  }
  func.func @transform_1(%arg0: i32, %arg1: i32) -> (i32, i32, i32) {
    %c0_i32 = arith.constant 0 : i32
    %c0_i32_0 = arith.constant 0 : i32
    %c0_i32_1 = arith.constant 0 : i32
    return %c0_i32, %arg0, %c0_i32_0 : i32, i32, i32
  }
  func.func @transform_2(%arg0: i32, %arg1: i32) -> (i32, i32, i32) {
    %c0_i32 = arith.constant 0 : i32
    %c0_i32_0 = arith.constant 0 : i32
    return %arg1, %arg0, %c0_i32 : i32, i32, i32
  }
  func.func @transform_3(%arg0: i32, %arg1: i32) -> (i32, i32, i32) {
    %c0_i32 = arith.constant 0 : i32
    %c0_i32_0 = arith.constant 0 : i32
    return %arg1, %arg0, %c0_i32 : i32, i32, i32
  }
}

</mosaic_0001>

<bundles_post_ra>
// kernel: tpu_custom_call.1
= control target key start
LH: loop header
LB: loop body
LE: loop exit
PB: predicated region body
PF: predicated region fallthrough
CT: control target
= control target key end

     0   :  { %8 = vsyncpa [#allocation3], 0  ;;  %s948_s0 = inlined_call_operand.hbm [shape: f32[2,16,128], index: 0, kind: input, shape index: {}]   ;;  %s949_s1 = inlined_call_operand.hbm [shape: f32[1,16,128], index: 1, kind: input, shape index: {}]   ;;  %s950_s2 = inlined_call_operand.hbm [shape: u32[2,16,128], index: 2, kind: input, shape index: {}]   ;;  %s951_s3 = inlined_call_operand.hbm [shape: f32[2,16,128], index: 3, kind: output, shape index: {}]  }
   0x1   :  { %10 = vsyncpa [#allocation3 + $0x1], 0 }
   0x2   :  { %11 = vsyncpa [#allocation6], 0 }
   0x3   :  { %12 = vsyncpa [#allocation4], 0 }
   0x4   :  { %14 = vsyncpa [#allocation4 + $0x1], 0  ;;  %s735_s12 = smov 0   ;;  %s737_s13 = smov 0  }
   0x5   :  { %s739_s14 = smov 0   ;;  %s741_s15 = smov 0  }
   0x6   :  { %s743_s16 = smov 0   ;;  %s745_s17 = smov 0  }
   0x7 LB: > { %s29_s18 = sadd.s32 1, %s701_s16  ;;  %s41_s19 = sadd.s32 1, %s693_s14  ;;  %s705_s17 = sphi %s745_s17, %s20_s17   ;;  %s701_s16 = sphi %s743_s16, %s970_s16   ;;  %s697_s15 = sphi %s741_s15, %s969_s15   ;;  %s693_s14 = sphi %s739_s14, %s968_s14   ;;  %s689_s13 = sphi %s737_s13, %s967_s13   ;;  %s685_s12 = sphi %s735_s12, %s966_s12  }
   0x8   : > { %p30_p0 = scmp.ge.s32.totalorder %s29_s18, 2  ;;  %p48_p1 = scmp.ne.s32.totalorder %s693_s14, %s689_s13 }
   0x9   : > { %p49_p2 = scmp.eq.s32.totalorder %s705_s17, 0  ;;  %p479_p6 = scmp.lt.s32.totalorder %s705_s17, 2 }
   0xa   : > { %s972_s18 = smov (%p30_p0, %s29_s18), 0  ;;  %s176_s22 = sand.u32 1, %s705_s17  }
   0xb   : > { %p775_p3 = por %p49_p2, %p48_p1  ;;  %s36_s21 = ssub.s32 %s701_s16, %s972_s18 }
   0xc   : > { %p39_p5 = scmp.eq.s32.totalorder %s36_s21, 0  ;;  %s178_s23 = sand.u32 1, %s693_s14  }
   0xd   : > { %s788_s25 = sshll.u32 %s178_s23, 4  ;;  %s450_s26 = sshll.u32 %s701_s16, 8 }
   0xe   : > { %s786_s24 = scalar_select %p39_p5, %s693_s14, %s41_s19  }
   0xf   : > { %s188_s29 = scalar_lea.hbm %s948_s0, %s450_s26  ;;  %s180_s30 = scalar_lea.vmem [#allocation2], %s788_s25 }
  0x10   : > { %s189_s4 = sshll.u32 %s180_s30, 4  ;;  %p797_p7 = pnand %p479_p6, %p775_p3  ;;  %s190_s4 = int_to_ptr.vmem [resolvable:$true] %s189_s4 }
  0x11   : > { %s804_s8 = scalar_lea.hbm %s950_s2, %s450_s26  ;;  %s806_s9 = scalar_lea.sflag [#allocation3], %s176_s22 }
  0x12   : > { %p537_p8 = pneg %p797_p7  ;;  %s548_s10 = scalar_lea.vmem %s190_s4, 256 }
  0x13   : > { %p549_p9 = scmp.ne.s32.totalorder %s190_s4, %s548_s10  ;;  %s707_s11 = smov [#allocation2]  }
  0x14   : > { %s553_s19 = sshll.u32 %s707_s11, 4  ;;  %s554_s19 = int_to_ptr.vmem [resolvable:$false] %s553_s19 }
  0x15   : > { %p551_p10 = pnand %p549_p9, %p537_p8  ;;  %s555_s20 = scalar_lea.vmem %s554_s19, 512 }
  0x16   : > { %p556_p12 = scmp.lt.s32.totalorder %s190_s4, %s554_s19  ;;  %p557_p13 = scmp.lt.s32.totalorder %s555_s20, %s548_s10 }
  0x17   : > { %p552_p11 = pneg %p551_p10 }
  0x18   : > { %p558_p0 = por %p557_p13, %p556_p12 }
  0x1a   : > { %p559_p2 = pnand %p558_p0, %p552_p11 }
  0x1c   : > { %562 = shalt.err (!%p559_p2)
}
  0x1d   : > { %s708_s21 = smov 128   ;;  %s709_s22 = smov 8  }
  0x1e   : > { %470 = dma.hbm_to_vmem [thread:$0]  (!%p797_p7), %s188_s29, 256, %s190_s4, %s806_s9, %s708_s21, %s708_s21, %s709_s22  }
  0x1f   : > { %s203_s23 = scalar_lea.vmem [#allocation7], %s788_s25  ;;  %s821_s27 = sadd.s32 4294967295, %s705_s17  }
  0x20   : > { %s212_s26 = sshll.u32 %s203_s23, 4  ;;  %s430_s28 = sadd.s32 4294967294, %s705_s17   ;;  %s213_s26 = int_to_ptr.vmem [resolvable:$true] %s212_s26 }
  0x21   : > { %p54_p3 = scmp.ne.s32.totalorder %s689_s13, %s685_s12  ;;  %p952_p5 = scmp.eq.s32.totalorder %s821_s27, 0 }
  0x22   : > { %p134_p6 = scmp.eq.s32.totalorder %s821_s27, 1  ;;  %p140_p9 = scmp.eq.s32.totalorder %s430_s28, 1 }
  0x23   : > { %p431_p10 = scmp.ge.s32.totalorder %s705_s17, 1  ;;  %p831_p11 = por %p952_p5, %p54_p3 }
  0x24   : > { %p838_p12 = por %p134_p6, %p48_p1  ;;  %p842_p13 = por %p140_p9, %p54_p3 }
  0x25   : > { %p147_p0 = scmp.lt.s32.totalorder %s705_s17, 3  ;;  %s710_s6 = smov [#allocation5]  }
  0x26   : > { %s957_s25 = scalar_select %p838_p12, 1, 0 }
  0x27   : > { %s958_s29 = scalar_select %p842_p13, 1, 0 }
  0x28   : > { %p847_p2 = pnand %p431_p10, %p147_p0  ;;  %s162_s7 = sshll.u32 %s710_s6, 4  ;;  %s163_s7 = int_to_ptr.vmem [resolvable:$true] %s162_s7 }
  0x29   : > { %s576_s10 = scalar_lea.vmem %s213_s26, 256  ;;  %s711_s11 = smov [#allocation7]  }
  0x2a   : > { %p463_p4 = pneg %p847_p2  ;;  %p577_p1 = scmp.ne.s32.totalorder %s213_s26, %s576_s10 }
  0x2b   : > { %s581_s19 = sshll.u32 %s711_s11, 4  ;;  %s582_s19 = int_to_ptr.vmem [resolvable:$false] %s581_s19 }
  0x2c   : > { %p579_p6 = pnand %p577_p1, %p537_p8  ;;  %s583_s20 = scalar_lea.vmem %s582_s19, 512 }
  0x2d   : > { %p584_p9 = scmp.lt.s32.totalorder %s213_s26, %s582_s19  ;;  %p585_p10 = scmp.lt.s32.totalorder %s583_s20, %s576_s10 }
  0x2e   : > { %p580_p3 = pneg %p579_p6 }
  0x2f   : > { %p586_p0 = por %p585_p10, %p584_p9 }
  0x31   : > { %p587_p5 = pnand %p586_p0, %p580_p3 }
  0x33   : > { %590 = shalt.err (!%p587_p5)
}
  0x34   : > { %473 = dma.hbm_to_vmem [thread:$0]  (!%p797_p7), %s804_s8, 256, %s213_s26, %s806_s9, %s708_s21, %s708_s21, %s709_s22  }
  0x35   : > { %p960_p8 = scmp.eq.s32.totalorder %s821_s27, 0  ;;  %s602_s23 = scalar_lea.vmem %s163_s7, 256 }
  0x36   : > { %p603_p9 = scmp.ne.s32.totalorder %s163_s7, %s602_s23  ;;  %p610_p10 = scmp.lt.s32.totalorder %s163_s7, %s163_s7 }
  0x37   : > { %p464_p1 = pnand %p463_p4, %p960_p8  ;;  %p611_p0 = scmp.lt.s32.totalorder %s602_s23, %s602_s23 }
  0x39   : > { %p593_p6 = pneg %p464_p1  ;;  %p612_p13 = por %p611_p0, %p610_p10 }
  0x3b   : > { %p605_p3 = pnand %p603_p9, %p593_p6 }
  0x3d   : > { %p606_p5 = pneg %p605_p3 }
  0x3f   : > { %p613_p12 = pnand %p612_p13, %p606_p5 }
  0x41   : > { %616 = shalt.err (!%p613_p12)
}
  0x42   : > { %466 = dma.hbm_to_vmem [thread:$0]  (!%p464_p1), %s949_s1, 256, %s163_s7, [#allocation6], %s708_s21, %s708_s21, %s709_s22  }
  0x43   : > { %224 = sbr.rel (%p847_p2) target bundleno = 105 (0x69), region = 32  ;;  %s226_s9 = sand.u32 (!%p847_p2), 1, %s821_s27  }
  0x44   : > { %s228_s26 = sand.u32 (!%p847_p2), 1, %s689_s13   ;;  %s227_s6 = scalar_lea.sflag (!%p847_p2), [#allocation3], %s226_s9 }
  0x45   : > { %s441_s28 = sshll.u32 (!%p847_p2), %s228_s26, 4 }
  0x46   : > { %s230_s10 = scalar_lea.vmem (!%p847_p2), [#allocation2], %s441_s28 }
  0x48   : > { %668 = dma.done.wait (%p831_p11), %s227_s6, 256  }
  0x49   : > { %670 = vsyncadd (%p831_p11), %s227_s6, 4294967040  ;;  %p961_p4 = scmp.eq.s32.totalorder %s821_s27, 0 }
  0x4b   : > { %672 = dma.done.wait (%p961_p4), [#allocation6], 256   ;;  %p962_p7 = pmov %p961_p4 }
  0x4c   : > { %s243_s21 = scalar_lea.vmem [#allocation7], %s441_s28 }
  0x4d   : > { %674 = vsyncadd (%p962_p7), [#allocation6], 4294967040 }
  0x4e   : > { %676 = dma.done.wait (%p831_p11), %s227_s6, 256  }
  0x4f   : > { %678 = vsyncadd (%p831_p11), %s227_s6, 4294967040  ;;  %v275_v0 = vld [vmem:[%s230_s10] sm:$0xff]  ;;  %v281_v2 = vld [vmem:[%s243_s21] sm:$0xff]  ;;  %s270_s22 = scalar_lea.vmem [#allocation8], %s441_s28  ;;  %s452_s27 = sshll.u32 %s697_s15, 8 }
  0x50   : > { %v277_v1 = vld [vmem:[#allocation5] sm:$0xff]  ;;  %s307_s4 = sshll.u32 %s270_s22, 4  ;;  %v276_v4 = vld [vmem:[%s230_s10 + $0x8] sm:$0xff]  ;;  %v282_v6 = vld [vmem:[%s243_s21 + $0x8] sm:$0xff]  ;;  %vm283_vm0 = vcmp.ge.u32.totalorder %v281_v2, 429496730  ;;  %s898_s11 = scalar_lea.hbm %s951_s3, %s452_s27  ;;  %s893_s4 = int_to_ptr.vmem [resolvable:$true] %s307_s4 }
  0x51   : > { %v279_v3 = vadd.f32 %v277_v1, %v275_v0  ;;  %v278_v5 = vld [vmem:[#allocation5 + $0x8] sm:$0xff]  ;;  %vm284_vm1 = vcmp.ge.u32.totalorder %v282_v6, 429496730  ;;  %s902_s15 = scalar_lea.sflag [#allocation4], %s228_s26  ;;  %s617_s19 = scalar_lea.vmem %s893_s4, 256 }
  0x52   : > { %v280_v7 = vadd.f32 %v278_v5, %v276_v4  ;;  %p618_p11 = scmp.ne.s32.totalorder %s893_s4, %s617_s19  ;;  %p963_p12 = scmp.ne.s32.totalorder %s957_s25, 0 }
  0x53   : > { %v285_v8 = vmul.f32 1.1111112, %v279_v3  ;;  %s712_s20 = smov [#allocation8]  }
  0x54   : > { %v286_v9 = vmul.f32 1.1111112, %v280_v7  ;;  %p619_p13 = pnand %p618_p11, %p963_p12  ;;  %s621_s23 = sshll.u32 %s712_s20, 4  ;;  %s622_s23 = int_to_ptr.vmem [resolvable:$false] %s621_s23 }
  0x55   : > { %v287_v10 = vsel %vm283_vm0, %v285_v8, 0.0  ;;  %s623_s5 = scalar_lea.vmem %s622_s23, 512  ;;  %p624_p8 = scmp.lt.s32.totalorder %s893_s4, %s622_s23 }
  0x56   : > { %289 = vst [vmem:[%s270_s22] sm:$0xff] %v287_v10  ;;  %v288_v11 = vsel %vm284_vm1, %v286_v9, 0.0  ;;  %p620_p2 = pneg %p619_p13  ;;  %p625_p1 = scmp.lt.s32.totalorder %s623_s5, %s617_s19 }
  0x57   : > { %290 = vst [vmem:[%s270_s22 + $0x8] sm:$0xff] %v288_v11 }
  0x58   : > { %p626_p6 = por %p625_p1, %p624_p8 }
  0x5a   : > { %p627_p9 = pnand %p626_p6, %p620_p2 }
  0x5c   : > { %630 = shalt.err (!%p627_p9)
}
  0x5d   : > { %s631_s8 = scalar_lea.hbm %s898_s11, 256  ;;  %s635_s28 = scalar_lea.hbm %s951_s3, 512 }
  0x5e   : > { %p632_p3 = scmp.ne.s32.totalorder %s898_s11, %s631_s8  ;;  %p636_p0 = scmp.lt.s32.totalorder %s898_s11, %s951_s3 }
  0x5f   : > { %p637_p4 = scmp.lt.s32.totalorder %s635_s28, %s631_s8 }
  0x60   : > { %p633_p5 = pnand %p632_p3, %p963_p12 }
  0x61   : > { %p638_p7 = por %p637_p4, %p636_p0 }
  0x62   : > { %p634_p10 = pneg %p633_p5 }
  0x64   : > { %p639_p11 = pnand %p638_p7, %p634_p10 }
  0x66   : > { %642 = shalt.err (!%p639_p11)
}
  0x67   : > { %s713_s21 = smov 128   ;;  %s714_s22 = smov 8  }
  0x68   : > { %461 = dma.vmem_to_hbm [thread:$0]  (%p963_p12), %s893_s4, 256, %s898_s11, %s902_s15, %s713_s21, %s713_s21, %s714_s22  }
  0x69 PF: > { %s322_s27 = sand.u32 1, %s685_s12   ;;  %p964_p13 = scmp.ne.s32.totalorder %s958_s29, 0 }
  0x6a   : > { %p965_p2 = scmp.ge.s32.totalorder %s705_s17, 2  ;;  %s323_s30 = scalar_lea.sflag [#allocation4], %s322_s27 }
  0x6c   : > { %p475_p8 = pnand %p965_p2, %p964_p13 }
  0x6e   : > { %p476_p1 = pneg %p475_p8 }
  0x70   : > { %680 = dma.done.wait (%p476_p1), %s323_s30, 256  }
  0x71   : > { %682 = vsyncadd (%p476_p1), %s323_s30, 4294967040  ;;  %s20_s17 = sadd.s32 1, %s705_s17   ;;  %s966_s12 = smov %s689_s13 }
  0x72   : > { %p17_p6 = scmp.ge.s32.totalorder %s20_s17, 4   ;;  %s967_s13 = smov %s693_s14 }
  0x73   : > { %s968_s14 = smov %s786_s24  ;;  %s969_s15 = smov %s701_s16 }
  0x74   : > { %s970_s16 = smov %s972_s18  ;;  %19 = sbr.rel (!%p17_p6) target bundleno = 7 (0x7), region = 93 }
  0x79   :  { %328 = vsyncpa [#allocation3], 1 }
  0x7a   :  { %330 = vsyncpa [#allocation3 + $0x1], 1 }
  0x7b   :  { %331 = vsyncpa [#allocation6], 1 }
  0x7c   :  { %332 = vsyncpa [#allocation4], 1 }
  0x7d   :  { %334 = vsyncpa [#allocation4 + $0x1], 1 }

</bundles_post_ra>
